<compile_context>
chip_gen: v6e
topology: v6e:2x2x1
jax: 0.10.0
libtpu: 0.0.40
codegen_flags: <defaults>
</compile_context>

<pallas_src>
import math
from functools import partial

import jax
import jax.numpy as jnp
from jax.experimental import pallas as pl
from jax.experimental.pallas import tpu as pltpu


# ---------------------------------------------------------------------------
# Pallas kernel: identity copy of one lane-dense tile.
# ---------------------------------------------------------------------------
def _copy_kernel(x_ref, o_ref):
    o_ref[...] = x_ref[...]


def _pick_tile(dim, unit, max_tile):
    """Largest exact-divisor tile of `dim` that is a multiple of `unit` and
    <= max_tile.  Falls back to the full dim (block dim == array dim is always
    a legal TPU block shape)."""
    if dim % unit != 0:
        return dim
    t = min(max_tile, dim)
    t = (t // unit) * unit
    while t >= unit:
        if dim % t == 0:
            return t
        t -= unit
    return dim


@partial(jax.jit, static_argnames=("c", "h", "w"))
def _unflatten_forward(x, *, c, h, w):
    b = x.shape[0]
    d = math.prod(x.shape[1:])

    # Metadata-only flatten (contiguous row-major) so the kernel sees a
    # lane-dense 2-D slab with the long axis last.
    x_flat = x.reshape(b, d)

    # Small-D guard: fold batch into the lane axis so stores stay lane-dense
    # (avoids masked partial stores when d < one lane group).
    if d < 128:
        rows, cols = 1, b * d
        x2 = x_flat.reshape(rows, cols)
    else:
        rows, cols = b, d
        x2 = x_flat

    # Tile sizes: exact divisors, (8,128)-aligned when possible, capped so each
    # buffer is <= ~2 MiB (f32) -> in/out double-buffers <= 8 MiB total, which
    # fits the scoped-VMEM defaults on v5e (16 MiB), v6e (32 MiB), v7x (32 MiB).
    tb = _pick_tile(rows, 8, 128)     # sublane tile
    td = _pick_tile(cols, 128, 4096)  # lane tile

    grid = (rows // tb, cols // td)

    out2 = pl.pallas_call(
        _copy_kernel,
        out_shape=jax.ShapeDtypeStruct((rows, cols), x.dtype),
        grid=grid,
        in_specs=[pl.BlockSpec((tb, td), lambda i, j: (i, j))],
        out_specs=pl.BlockSpec((tb, td), lambda i, j: (i, j)),
        input_output_aliases={0: 0},
        compiler_params=pltpu.CompilerParams(
            dimension_semantics=("parallel", "parallel")),
    )(x2)

    # Metadata-only reshape to the PyTorch NCHW view shape (no data movement).
    return out2.reshape(b, c, h, w)


# ---------------------------------------------------------------------------
# Module wrapper (mirrors the PyTorch UnFlatten constructor / forward).
# ---------------------------------------------------------------------------
class UnFlatten:
    def __init__(self, unflatten_size):
        if isinstance(unflatten_size, tuple):
            self.c = unflatten_size[0]
            self.h = unflatten_size[1]
            self.w = unflatten_size[2]
        elif isinstance(unflatten_size, int):
            self.c = unflatten_size
            self.h = 1
            self.w = 1
        else:
            raise TypeError("unflatten_size must be a tuple or an int")

    def __call__(self, x):
        # Same contract as torch .view: per-row element count must match (static check).
        d = math.prod(x.shape[1:])
        assert d == self.c * self.h * self.w, (x.shape, (self.c, self.h, self.w))
        return _unflatten_forward(x, c=self.c, h=self.h, w=self.w)


# ---------------------------------------------------------------------------
if __name__ == "__main__":
    key = jax.random.PRNGKey(0)
    k1, k2, k3 = jax.random.split(key, 3)

    # Canonical case: flat (2, 1024) -> (2, 4, 16, 16)
    unflatten = UnFlatten((4, 16, 16))
    x = jax.random.normal(k1, (2, 1024), jnp.float32)
    y = jax.block_until_ready(unflatten(x))
    y_ref = x.reshape(2, 4, 16, 16)
    assert y.shape == y_ref.shape, (y.shape, y_ref.shape)
    assert jnp.array_equal(y, y_ref), float(jnp.max(jnp.abs(y - y_ref)))

    # Already-shaped input: (2, 4, 16, 16) -> (2, 4, 16, 16) (view is still legal)
    x1 = jax.random.normal(k3, (2, 4, 16, 16), jnp.float32)
    y1 = jax.block_until_ready(unflatten(x1))
    y1_ref = x1.reshape(2, 4, 16, 16)
    assert y1.shape == y1_ref.shape, (y1.shape, y1_ref.shape)
    assert jnp.array_equal(y1, y1_ref), float(jnp.max(jnp.abs(y1 - y1_ref)))

    # Int case (small D, folded into lane axis): (2, 8) -> (2, 8, 1, 1)
    unflatten_int = UnFlatten(8)
    x2 = jax.random.normal(k2, (2, 8), jnp.float32)
    y2 = jax.block_until_ready(unflatten_int(x2))
    y2_ref = x2.reshape(2, 8, 1, 1)
    assert y2.shape == y2_ref.shape, (y2.shape, y2_ref.shape)
    assert jnp.array_equal(y2, y2_ref), float(jnp.max(jnp.abs(y2 - y2_ref)))

    print("KERNEL_OK")
</pallas_src>

<mosaic_0001>
module attributes {stable_mosaic.version = 11 : i64} {
  func.func @_copy_kernel(%arg0: i32, %arg1: i32, %arg2: memref<2x1024xf32, #tpu.memory_space<vmem>>, %arg3: memref<2x1024xf32, #tpu.memory_space<vmem>>) attributes {dimension_semantics = [#tpu.dimension_semantics<parallel>, #tpu.dimension_semantics<parallel>], iteration_bounds = array<i64: 1, 1>, scalar_prefetch = 0 : i64, scratch_operands = 0 : i64, tpu.core_type = #tpu.core_type<tc>, window_params = [{transform_indices = @transform_0, window_bounds = array<i64: 2, 1024>}, {transform_indices = @transform_1, window_bounds = array<i64: 2, 1024>}]} {
    %c0 = arith.constant 0 : index
    %c0_0 = arith.constant 0 : index
    %0 = vector.load %arg2[%c0, %c0_0] : memref<2x1024xf32, #tpu.memory_space<vmem>>, vector<2x1024xf32>
    %c0_1 = arith.constant 0 : index
    %c0_2 = arith.constant 0 : index
    %1 = vector.load %arg3[%c0_1, %c0_2] : memref<2x1024xf32, #tpu.memory_space<vmem>>, vector<2x1024xf32>
    tpu.vector_store %arg3[%c0_1, %c0_2], %0 {strides = array<i32>} : memref<2x1024xf32, #tpu.memory_space<vmem>>, vector<2x1024xf32>,
    return
  }
  func.func @transform_0(%arg0: i32, %arg1: i32) -> (i32, i32) {
    %c0_i32 = arith.constant 0 : i32
    return %arg0, %arg1 : i32, i32
  }
  func.func @transform_1(%arg0: i32, %arg1: i32) -> (i32, i32) {
    %c0_i32 = arith.constant 0 : i32
    return %arg0, %arg1 : i32, i32
  }
}

</mosaic_0001>

<bundles_post_ra>
// kernel: _unflatten_forward.1
= control target key start
LH: loop header
LB: loop body
LE: loop exit
PB: predicated region body
PF: predicated region fallthrough
CT: control target
= control target key end

     0   :  { %s38_s0 = inlined_call_operand.vmem [shape: f32[2,1024], index: 0, kind: input, shape index: {}, may-alias: {0,1}]   ;;  %s39_s1 = inlined_call_operand.vmem [shape: f32[2,1024], index: 1, kind: output, shape index: {}, may-alias: {0,1}]  }
   0x1   :  { %v8_v0 = vld [vmem:[%s38_s0] sm:$0xff]  ;;  %v9_v1 = vld [vmem:[%s38_s0 + $0x8] sm:$0xff] }
   0x2   :  { %10 = vst [vmem:[%s39_s1] sm:$0xff] %v8_v0  ;;  %11 = vst [vmem:[%s39_s1 + $0x8] sm:$0xff] %v9_v1 }

</bundles_post_ra>
